<compile_context>
chip_gen: v5e
topology: v5e:2x2
jax: 0.10.0
libtpu: 0.0.40
codegen_flags: <defaults>
</compile_context>

<pallas_src>
import functools

import jax
import jax.numpy as jnp
from jax.experimental import pallas as pl
from jax.experimental.pallas import tpu as pltpu

LANES = 128
SUBLANES = 8
MAX_ROW_TILE = 2048          # 2048 x 128 x 4B = 1 MiB per input block
NUM_CORE_SPLITS = 2          # leading "parallel" grid axis (2 TCs on v7x)


def _sse_kernel(x_ref, y_ref, o_ref, *, rows, row_tile, blocks_per_core):
    c = pl.program_id(0)       # core-split index ("parallel")
    i = pl.program_id(1)       # row-block index within this split ("arbitrary")

    # Zero this split's (1, 8, 128) accumulator at the start of its loop.
    @pl.when(i == 0)
    def _():
        o_ref[...] = jnp.zeros_like(o_ref)

    # Logical row-block handled this step; may run past the end of the slab
    # (the index_map clamps the DMA, and the mask below zeroes the overrun).
    blk = c * blocks_per_core + i
    remaining = rows - blk * row_tile          # valid rows left (may be <= 0)

    x = x_ref[...].astype(jnp.float32)
    y = y_ref[...].astype(jnp.float32)
    d = x - y

    row_ids = jax.lax.broadcasted_iota(jnp.int32, (row_tile, LANES), 0)
    d = jnp.where(row_ids < remaining, d, 0.0)

    # Reduce only the sublane-group axis: (row_tile, 128) ->
    # (row_tile//8, 8, 128) -> sum over axis 0.  Pure VPU adds; keeps the
    # (8, 128) vreg-shaped partial so no per-step XLU full reduce or scalar
    # SMEM read-modify-write serializes the grid loop.
    d2 = (d * d).reshape(row_tile // SUBLANES, SUBLANES, LANES)
    o_ref[...] += jnp.sum(d2, axis=0)[None, :, :]


def _to_2d(a):
    """Flatten to a lane-dense (rows, 128) slab; pad only if needed (<128 elems)."""
    flat = a.reshape(-1)
    n = flat.shape[0]
    pad = (-n) % LANES
    if pad:
        flat = jnp.pad(flat, (0, pad))
    return flat.reshape(-1, LANES)


def center_loss(outputs, targets):
    """sum((outputs - targets)^2) / outputs.shape[0], computed in Pallas."""
    assert outputs.shape == targets.shape
    batch = outputs.shape[0]

    x2d = _to_2d(outputs)
    y2d = _to_2d(targets)
    rows = x2d.shape[0]

    # Block sizing: ~1 MiB per input block, shrunk (to a multiple of 8 rows)
    # for tiny inputs so we don't allocate huge mostly-masked buffers.
    rows_rounded = ((rows + SUBLANES - 1) // SUBLANES) * SUBLANES
    row_tile = min(MAX_ROW_TILE, rows_rounded)

    nb = pl.cdiv(rows, row_tile)             # real row-blocks
    bpc = pl.cdiv(nb, NUM_CORE_SPLITS)       # row-blocks per core split

    def in_map(c, i):
        # Clamp so the DMA never targets a fully out-of-range block; the
        # in-kernel row mask zeroes any overrun contribution.
        return (jnp.minimum(c * bpc + i, nb - 1), 0)

    kernel = functools.partial(
        _sse_kernel, rows=rows, row_tile=row_tile, blocks_per_core=bpc
    )

    partials = pl.pallas_call(
        kernel,
        out_shape=jax.ShapeDtypeStruct(
            (NUM_CORE_SPLITS, SUBLANES, LANES), jnp.float32
        ),
        grid_spec=pltpu.PrefetchScalarGridSpec(
            num_scalar_prefetch=0,
            grid=(NUM_CORE_SPLITS, bpc),
            in_specs=[
                pl.BlockSpec((row_tile, LANES), in_map),
                pl.BlockSpec((row_tile, LANES), in_map),
            ],
            out_specs=pl.BlockSpec(
                (1, SUBLANES, LANES), lambda c, i: (c, 0, 0)
            ),
        ),
        compiler_params=pltpu.CompilerParams(
            dimension_semantics=("parallel", "arbitrary"),
        ),
    )(x2d, y2d)

    sse = jnp.sum(partials)                  # single final reduce, in JAX
    return (sse / jnp.float32(batch)).astype(jnp.float32)


if __name__ == "__main__":
    key = jax.random.PRNGKey(0)
    k1, k2 = jax.random.split(key)

    # Small NCHW-like shapes: batch=2, channels=4, spatial=16x16.
    outputs = jax.random.normal(k1, (2, 4, 16, 16), dtype=jnp.float32)
    targets = jax.random.normal(k2, (2, 4, 16, 16), dtype=jnp.float32)

    loss = center_loss(outputs, targets)
    jax.block_until_ready(loss)

    # Reference check in plain JAX.
    ref = jnp.sum((outputs - targets) ** 2) / outputs.shape[0]
    assert jnp.allclose(loss, ref, rtol=1e-5, atol=1e-5), (loss, ref)

    print("KERNEL_OK")
</pallas_src>

<mosaic_0001>
module attributes {stable_mosaic.version = 11 : i64} {
  func.func @_sse_kernel(%arg0: i32, %arg1: i32, %arg2: memref<16x128xf32, #tpu.memory_space<vmem>>, %arg3: memref<16x128xf32, #tpu.memory_space<vmem>>, %arg4: memref<1x8x128xf32, #tpu.memory_space<vmem>>) attributes {dimension_semantics = [#tpu.dimension_semantics<parallel>, #tpu.dimension_semantics<arbitrary>], iteration_bounds = array<i64: 2, 1>, scalar_prefetch = 0 : i64, scratch_operands = 0 : i64, tpu.core_type = #tpu.core_type<tc>, window_params = [{transform_indices = @transform_0, window_bounds = array<i64: 16, 128>}, {transform_indices = @transform_1, window_bounds = array<i64: 16, 128>}, {transform_indices = @transform_2, window_bounds = array<i64: 1, 8, 128>}]} {
    %c0_i32 = arith.constant 0 : i32
    %0 = arith.cmpi eq, %arg1, %c0_i32 : i32
    %1 = arith.extui %0 : i1 to i32
    %c0_i32_0 = arith.constant 0 : i32
    %2 = arith.cmpi ne, %1, %c0_i32_0 : i32
    scf.if %2 {
      %cst_12 = arith.constant 0.000000e+00 : f32
      %22 = vector.broadcast %cst_12 : f32 to vector<1x8x128xf32>
      %c0_13 = arith.constant 0 : index
      %c0_14 = arith.constant 0 : index
      %c0_15 = arith.constant 0 : index
      %23 = vector.load %arg4[%c0_13, %c0_14, %c0_15] : memref<1x8x128xf32, #tpu.memory_space<vmem>>, vector<1x8x128xf32>
      tpu.vector_store %arg4[%c0_13, %c0_14, %c0_15], %22 {strides = array<i32>} : memref<1x8x128xf32, #tpu.memory_space<vmem>>, vector<1x8x128xf32>,
    } else {
    }
    %c1_i32 = arith.constant 1 : i32
    %3 = arith.muli %arg0, %c1_i32 : i32
    %4 = arith.addi %3, %arg1 : i32
    %c16_i32 = arith.constant 16 : i32
    %5 = arith.muli %4, %c16_i32 : i32
    %c16_i32_1 = arith.constant 16 : i32
    %6 = arith.subi %c16_i32_1, %5 : i32
    %c0 = arith.constant 0 : index
    %c0_2 = arith.constant 0 : index
    %7 = vector.load %arg2[%c0, %c0_2] : memref<16x128xf32, #tpu.memory_space<vmem>>, vector<16x128xf32>
    %c0_3 = arith.constant 0 : index
    %c0_4 = arith.constant 0 : index
    %8 = vector.load %arg3[%c0_3, %c0_4] : memref<16x128xf32, #tpu.memory_space<vmem>>, vector<16x128xf32>
    %9 = arith.subf %7, %8 : vector<16x128xf32>
    %10 = tpu.iota {dimensions = array<i32: 0>} : vector<16x128xi32>
    %11 = vector.broadcast %6 : i32 to vector<16x128xi32>
    %12 = arith.cmpi slt, %10, %11 : vector<16x128xi32>
    %cst = arith.constant 0.000000e+00 : f32
    %13 = vector.broadcast %cst : f32 to vector<16x128xf32>
    %14 = arith.select %12, %9, %13 : vector<16x128xi1>, vector<16x128xf32>
    %15 = arith.mulf %14, %14 : vector<16x128xf32>
    %16 = vector.shape_cast %15 : vector<16x128xf32> to vector<2x8x128xf32>
    %c0_5 = arith.constant 0 : index
    %c0_6 = arith.constant 0 : index
    %c0_7 = arith.constant 0 : index
    %17 = vector.load %arg4[%c0_5, %c0_6, %c0_7] : memref<1x8x128xf32, #tpu.memory_space<vmem>>, vector<1x8x128xf32>
    %cst_8 = arith.constant dense<0.000000e+00> : vector<8x128xf32>
    %18 = vector.multi_reduction <add>, %16, %cst_8 [0] : vector<2x8x128xf32> to vector<8x128xf32>
    %19 = vector.shape_cast %18 : vector<8x128xf32> to vector<1x8x128xf32>
    %20 = arith.addf %17, %19 : vector<1x8x128xf32>
    %c0_9 = arith.constant 0 : index
    %c0_10 = arith.constant 0 : index
    %c0_11 = arith.constant 0 : index
    %21 = vector.load %arg4[%c0_9, %c0_10, %c0_11] : memref<1x8x128xf32, #tpu.memory_space<vmem>>, vector<1x8x128xf32>
    tpu.vector_store %arg4[%c0_9, %c0_10, %c0_11], %20 {strides = array<i32>} : memref<1x8x128xf32, #tpu.memory_space<vmem>>, vector<1x8x128xf32>,
    return
  }
  func.func @transform_0(%arg0: i32, %arg1: i32) -> (i32, i32) {
    %c1_i32 = arith.constant 1 : i32
    %0 = arith.muli %arg0, %c1_i32 : i32
    %1 = arith.addi %0, %arg1 : i32
    %c0_i32 = arith.constant 0 : i32
    %2 = arith.minsi %1, %c0_i32 : i32
    %c0_i32_0 = arith.constant 0 : i32
    %c0_i32_1 = arith.constant 0 : i32
    return %2, %c0_i32_0 : i32, i32
  }
  func.func @transform_1(%arg0: i32, %arg1: i32) -> (i32, i32) {
    %c1_i32 = arith.constant 1 : i32
    %0 = arith.muli %arg0, %c1_i32 : i32
    %1 = arith.addi %0, %arg1 : i32
    %c0_i32 = arith.constant 0 : i32
    %2 = arith.minsi %1, %c0_i32 : i32
    %c0_i32_0 = arith.constant 0 : i32
    %c0_i32_1 = arith.constant 0 : i32
    return %2, %c0_i32_0 : i32, i32
  }
  func.func @transform_2(%arg0: i32, %arg1: i32) -> (i32, i32, i32) {
    %c0_i32 = arith.constant 0 : i32
    %c0_i32_0 = arith.constant 0 : i32
    %c0_i32_1 = arith.constant 0 : i32
    return %arg0, %c0_i32, %c0_i32_0 : i32, i32, i32
  }
}

</mosaic_0001>

<bundles_post_ra>
// kernel: tpu_custom_call.1
= control target key start
LH: loop header
LB: loop body
LE: loop exit
PB: predicated region body
PF: predicated region fallthrough
CT: control target
= control target key end

     0   :  { %7 = vsyncpa [#allocation3], 0  ;;  %s861_s0 = inlined_call_operand.hbm [shape: f32[16,128], index: 0, kind: input, shape index: {}]   ;;  %s862_s1 = inlined_call_operand.hbm [shape: f32[16,128], index: 1, kind: input, shape index: {}]   ;;  %s863_s2 = inlined_call_operand.hbm [shape: f32[2,8,128], index: 2, kind: output, shape index: {}]  }
   0x1   :  { %9 = vsyncpa [#allocation3 + $0x1], 0 }
   0x2   :  { %10 = vsyncpa [#allocation6], 0 }
   0x3   :  { %12 = vsyncpa [#allocation6 + $0x1], 0 }
   0x4   :  { %13 = vsyncpa [#allocation4], 0 }
   0x5   :  { %15 = vsyncpa [#allocation4 + $0x1], 0  ;;  %s692_s9 = smov 0   ;;  %s694_s10 = smov 0  }
   0x6   :  { %s696_s11 = smov 0   ;;  %s698_s12 = smov 0  }
   0x7   :  { %s700_s13 = smov 0   ;;  %s702_s14 = smov 0  }
   0x8   :  { %s704_s15 = smov 0   ;;  %s706_s16 = smov 0  }
   0x9 LB: > { %s389_s17 = sadd.s32 4294967295, %s671_s16   ;;  %s390_s18 = sadd.s32 4294967294, %s671_s16   ;;  %s671_s16 = sphi %s706_s16, %s21_s16   ;;  %s667_s15 = sphi %s704_s15, %s875_s15   ;;  %s663_s14 = sphi %s702_s14, %s874_s14   ;;  %s659_s13 = sphi %s700_s13, %s851_s13   ;;  %s655_s12 = sphi %s698_s12, %s873_s12   ;;  %s651_s11 = sphi %s696_s11, %s872_s11   ;;  %s647_s10 = sphi %s694_s10, %s871_s10   ;;  %s643_s9 = sphi %s692_s9, %s870_s9  }
   0xa   : > { %s33_s19 = sadd.s32 1, %s667_s15  ;;  %p640_p1 = scmp.ne.s32.totalorder %s659_s13, 0 }
   0xb   : > { %p35_p0 = scmp.ge.s32.totalorder %s33_s19, 2  ;;  %p54_p2 = scmp.eq.s32.totalorder %s671_s16, 0 }
   0xc   : > { %p59_p3 = scmp.ne.s32.totalorder %s659_s13, %s655_s12  ;;  %p60_p5 = scmp.eq.s32.totalorder %s389_s17, 0 }
   0xd   : > { %s877_s19 = smov (%p35_p0, %s33_s19), 0  ;;  %p738_p4 = por %p640_p1, %p54_p2 }
   0xe   : > { %p742_p6 = por %p60_p5, %p59_p3  ;;  %s101_s22 = ssub.s32 %s667_s15, %s877_s19 }
   0xf   : > { %p102_p7 = scmp.eq.s32.totalorder %s101_s22, 0  ;;  %s104_s23 = sadd.s32 1, %s651_s11 }
  0x10   : > { %p114_p8 = scmp.ne.s32.totalorder %s651_s11, %s647_s10  ;;  %p115_p9 = scmp.eq.s32.totalorder %s389_s17, 1 }
  0x11   : > { %s750_s24 = scalar_select %p102_p7, %s651_s11, %s104_s23  }
  0x12   : > { %p120_p10 = scmp.ne.s32.totalorder %s647_s10, %s643_s9  ;;  %p121_p11 = scmp.eq.s32.totalorder %s390_s18, 1 }
  0x13   : > { %p756_p12 = por %p115_p9, %p114_p8  ;;  %p392_p13 = scmp.ge.s32.totalorder %s671_s16, 2 }
  0x14   : > { %p761_p0 = por %p121_p11, %p120_p10  ;;  %p427_p1 = scmp.lt.s32.totalorder %s671_s16, 2 }
  0x15   : > { %s154_s29 = sshll.u32 %s861_s0, 4  ;;  %s673_s30 = smov [#allocation2]   ;;  %s155_s29 = int_to_ptr.hbm [resolvable:$true] %s154_s29 }
  0x16   : > { %s156_s3 = sshll.u32 %s673_s30, 4  ;;  %p771_p2 = pnand %p427_p1, %p738_p4  ;;  %s157_s3 = int_to_ptr.vmem [resolvable:$true] %s156_s3 }
  0x17   : > { %p399_p3 = scmp.ge.s32.totalorder %s671_s16, 1  ;;  %p189_p5 = scmp.lt.s32.totalorder %s671_s16, 3 }
  0x18   : > { %s504_s5 = sshra.s32 %s155_s29, 4  ;;  %p508_p8 = pneg %p771_p2  ;;  %s505_s5 = int_to_ptr.hbm [resolvable:$true] %s504_s5 }
  0x19   : > { %s506_s6 = scalar_lea.hbm %s505_s5, 16  ;;  %s511_s12 = scalar_lea.hbm %s861_s0, 16 }
  0x1a   : > { %p507_p7 = scmp.ne.s32.totalorder %s505_s5, %s506_s6  ;;  %p513_p4 = scmp.lt.s32.totalorder %s511_s12, %s506_s6 }
  0x1c   : > { %p509_p9 = pnand %p508_p8, %p507_p7 }
  0x1e   : > { %p510_p10 = pneg %p509_p9 }
  0x20   : > { %p515_p11 = pnand %p513_p4, %p510_p10 }
  0x22   : > { %518 = shalt.err (!%p515_p11)
}
  0x23   : > { %s674_s17 = smov 128   ;;  %s675_s18 = smov 8  }
  0x24   : > { %419 = dma.hbm_to_vmem [thread:$0]  (!%p771_p2), %s155_s29, 256, %s157_s3, [#allocation3], %s674_s17, %s674_s17, %s675_s18  }
  0x25   : > { %p791_p1 = pnand %p399_p3, %p189_p5  ;;  %s179_s27 = sshll.u32 %s862_s1, 4  ;;  %s180_s27 = int_to_ptr.hbm [resolvable:$true] %s179_s27 }
  0x26   : > { %s676_s28 = smov [#allocation5]   ;;  %s534_s5 = sshra.s32 %s180_s27, 4  ;;  %s535_s5 = int_to_ptr.hbm [resolvable:$true] %s534_s5 }
  0x27   : > { %s181_s30 = sshll.u32 %s676_s28, 4  ;;  %s536_s6 = scalar_lea.hbm %s535_s5, 16  ;;  %s182_s30 = int_to_ptr.vmem [resolvable:$true] %s181_s30 }
  0x28   : > { %p537_p7 = scmp.ne.s32.totalorder %s535_s5, %s536_s6  ;;  %s541_s7 = scalar_lea.hbm %s862_s1, 16 }
  0x29   : > { %p543_p3 = scmp.lt.s32.totalorder %s541_s7, %s536_s6 }
  0x2a   : > { %p539_p9 = pnand %p537_p7, %p508_p8 }
  0x2c   : > { %p540_p10 = pneg %p539_p9 }
  0x2e   : > { %p545_p5 = pnand %p543_p3, %p540_p10 }
  0x30   : > { %548 = shalt.err (!%p545_p5)
}
  0x31   : > { %422 = dma.hbm_to_vmem [thread:$0]  (!%p771_p2), %s180_s27, 256, %s182_s30, [#allocation6], %s674_s17, %s674_s17, %s675_s18  }
  0x32   : > { %193 = sbr.rel (%p791_p1) target bundleno = 75 (0x4b), region = 28  ;;  %s195_s8 = sand.u32 (!%p791_p1), 1, %s659_s13  }
  0x33   : > { %s400_s12 = sshll.u32 (!%p791_p1), %s195_s8, 4  ;;  %s196_s22 = scalar_lea.sflag (!%p791_p1), [#allocation3], %s195_s8 }
  0x34   : > { %s199_s23 = scalar_lea.vmem (!%p791_p1), [#allocation2], %s400_s12 }
  0x37   : > { %629 = dma.done.wait (%p742_p6), %s196_s22, 256  }
  0x38   : > { %631 = vsyncadd (%p742_p6), %s196_s22, 4294967040  ;;  %s206_s28 = scalar_lea.sflag [#allocation6], %s195_s8  ;;  %s209_s5 = scalar_lea.vmem [#allocation5], %s400_s12 }
  0x39   : > { %633 = dma.done.wait (%p742_p6), %s206_s28, 256  }
  0x3a   : > { %635 = vsyncadd (%p742_p6), %s206_s28, 4294967040  ;;  %s403_s4 = sshll.u32 %s663_s14, 4  ;;  %v258_v0 = vlaneseq  ;;  %s233_s18 = sand.u32 1, %s647_s10   ;;  %v252_v4 = vld [vmem:[%s199_s23] sm:$0xff]  ;;  %v253_v5 = vld [vmem:[%s199_s23 + $0x8] sm:$0xff] }
  0x3b   : > { %s251_s17 = ssub.s32 16, %s403_s4  ;;  %s402_s20 = sshll.u32 %s233_s18, 3  ;;  %v254_v6 = vld [vmem:[%s209_s5] sm:$0xff]  ;;  %v255_v7 = vld [vmem:[%s209_s5 + $0x8] sm:$0xff] }
  0x3c   : > { %v259_v1 = vshrl.u32 %v258_v0, 7  ;;  %v261_v3 = vstv %s251_s17  ;;  %s405_s27 = sshll.u32 %s663_s14, 3  ;;  %v256_v8 = vsub.f32 %v252_v4, %v254_v6  ;;  %v257_v9 = vsub.f32 %v253_v5, %v255_v7  ;;  %s235_s29 = scalar_lea.vmem [#allocation7], %s402_s20 }
  0x3d   : > { %s283_s6 = scalar_lea.hbm %s863_s2, %s405_s27  ;;  %s285_s3 = sshll.u32 %s235_s29, 4  ;;  %s286_s3 = int_to_ptr.vmem [resolvable:$true] %s285_s3 }
  0x3e   : > { %v260_v2 = vadd.s32 8, %v259_v1  ;;  %vm262_vm0 = vcmp.lt.s32.totalorder %v259_v1, %v261_v3  ;;  %s287_s7 = sshll.u32 %s283_s6, 4  ;;  %s273_s14 = scalar_lea.sflag [#allocation4], %s233_s18  ;;  %s288_s7 = int_to_ptr.hbm [resolvable:$true] %s287_s7 }
  0x3f   : > { %v264_v10 = vsel %vm262_vm0, %v256_v8, 0.0  ;;  %s578_s8 = sshra.s32 %s288_s7, 4  ;;  %s584_s28 = scalar_lea.hbm %s863_s2, 16  ;;  %s579_s8 = int_to_ptr.hbm [resolvable:$true] %s578_s8 }
  0x40   : > { %vm263_vm1 = vcmp.lt.s32.totalorder %v260_v2, %v261_v3  ;;  %v266_v12 = vmul.f32 %v264_v10, %v264_v10  ;;  %s580_s12 = scalar_lea.hbm %s579_s8, 8  ;;  %p585_p4 = scmp.lt.s32.totalorder %s579_s8, %s863_s2 }
  0x41   : > { %v265_v11 = vsel %vm263_vm1, %v257_v9, 0.0  ;;  %p581_p6 = scmp.ne.s32.totalorder %s579_s8, %s580_s12  ;;  %p586_p11 = scmp.lt.s32.totalorder %s584_s28, %s580_s12 }
  0x42   : > { %v267_v13 = vmul.f32 %v265_v11, %v265_v11 }
  0x43   : > { %p582_p2 = pnand %p581_p6, %p756_p12  ;;  %p587_p1 = por %p586_p11, %p585_p4 }
  0x44   : > { %v269_v14 = vadd.f32 %v267_v13, %v266_v12 }
  0x45   : > { %p583_p8 = pneg %p582_p2 }
  0x46   : > { %271 = vst [vmem:[%s235_s29] sm:$0xff] %v269_v14 }
  0x47   : > { %p588_p7 = pnand %p587_p1, %p583_p8 }
  0x49   : > { %591 = shalt.err (!%p588_p7)
}
  0x4a   : > { %414 = dma.vmem_to_hbm [thread:$0]  (%p756_p12), %s286_s3, 128, %s288_s7, %s273_s14  }
  0x4b PF: > { %s299_s17 = sand.u32 1, %s643_s9   ;;  %p424_p9 = pnand %p392_p13, %p761_p0 }
  0x4c   : > { %s300_s18 = scalar_lea.sflag [#allocation4], %s299_s17 }
  0x4d   : > { %p425_p10 = pneg %p424_p9 }
  0x4f   : > { %637 = dma.done.wait (%p425_p10), %s300_s18, 128  }
  0x50   : > { %639 = vsyncadd (%p425_p10), %s300_s18, 4294967168  ;;  %s21_s16 = sadd.s32 1, %s671_s16   ;;  %s870_s9 = smov %s647_s10 }
  0x51   : > { %p18_p3 = scmp.ge.s32.totalorder %s21_s16, 4   ;;  %s871_s10 = smov %s651_s11 }
  0x52   : > { %s872_s11 = smov %s750_s24  ;;  %s873_s12 = smov %s659_s13 }
  0x53   : > { %s851_s13 = smov 0   ;;  %s874_s14 = smov %s667_s15 }
  0x54   : > { %s875_s15 = smov %s877_s19  ;;  %20 = sbr.rel (!%p18_p3) target bundleno = 9 (0x9), region = 90 }
  0x59   :  { %306 = vsyncpa [#allocation3], 1 }
  0x5a   :  { %308 = vsyncpa [#allocation3 + $0x1], 1 }
  0x5b   :  { %309 = vsyncpa [#allocation6], 1 }
  0x5c   :  { %311 = vsyncpa [#allocation6 + $0x1], 1 }
  0x5d   :  { %312 = vsyncpa [#allocation4], 1 }
  0x5e   :  { %314 = vsyncpa [#allocation4 + $0x1], 1 }

</bundles_post_ra>
